<compile_context>
chip_gen: v7x
topology: tpu7x:2x2x1
jax: 0.10.0
libtpu: 0.0.40
codegen_flags: <defaults>
</compile_context>

<pallas_src>
import jax
import jax.numpy as jnp
from jax import lax
from jax.experimental import pallas as pl
from jax.experimental.pallas import tpu as pltpu

BN_EPS = 1e-5  # PyTorch BatchNorm1d default


def _round_up(a, m):
    return (a + m - 1) // m * m


def dense_block_forward(x, weight, bias, gamma, beta, *, block_b=8192):
    """ReLU(BatchNorm1d(Linear(x))) with training-mode batch statistics.

    x: (B, Cin); weight: (Cout, Cin); bias: (Cout,); gamma/beta: (Cout,).
    Returns (B, Cout) in x.dtype.
    """
    del bias  # algebraically cancelled by the train-mode BN mean subtraction
    B, Cin = x.shape
    Cout = weight.shape[0]
    out_dtype = x.dtype

    # Batch tile: multiple of 8 (sublane axis), as large as a conservative VMEM
    # budget allows for the double-buffered x + y tiles, capped by block_b and B.
    vmem_budget = 24 * 1024 * 1024
    bytes_per_row = 2 * 4 * (Cin + Cout)            # double-buffered f32 x + y rows
    tb_cap = max(8, (vmem_budget // bytes_per_row) // 8 * 8)
    tb = min(_round_up(block_b, 8), tb_cap, _round_up(B, 8))
    nt = pl.cdiv(B, tb)

    g2 = gamma.astype(jnp.float32).reshape(1, Cout)
    b2 = beta.astype(jnp.float32).reshape(1, Cout)
    n_first = float(min(tb, B))                     # valid rows in tile 0 (static)
    inv_n = 1.0 / float(B)

    def kernel(x_ref, w_ref, g_ref, bta_ref, y_ref, pivot_ref, s0_ref, s1_ref):
        p = pl.program_id(0)      # 0: stats pass, 1: normalize pass
        i = pl.program_id(1)      # batch tile index

        # z = x_tile @ W^T  -> (tb, Cout), contracting Cin on the MXU.
        z = lax.dot_general(
            x_ref[...], w_ref[...],
            dimension_numbers=(((1,), (1,)), ((), ())),
            preferred_element_type=jnp.float32,
        )

        @pl.when(p == 0)
        def _stats():
            row = lax.broadcasted_iota(jnp.int32, (tb, Cout), 0) + i * tb
            valid = row < B       # mask the ragged last tile's out-of-bounds rows

            @pl.when(i == 0)
            def _init():
                zm0 = jnp.where(valid, z, 0.0)
                # Per-channel pivot (~mean) to avoid E[z^2]-E[z]^2 cancellation.
                pivot_ref[...] = jnp.sum(zm0, axis=0, keepdims=True) * (1.0 / n_first)
                s0_ref[...] = jnp.zeros_like(s0_ref)
                s1_ref[...] = jnp.zeros_like(s1_ref)

            d = jnp.where(valid, z - pivot_ref[...], 0.0)
            s0_ref[...] += jnp.sum(d, axis=0, keepdims=True)
            s1_ref[...] += jnp.sum(d * d, axis=0, keepdims=True)

            @pl.when(i == nt - 1)
            def _finalize():
                dm = s0_ref[...] * inv_n
                mean = pivot_ref[...] + dm
                var = jnp.maximum(s1_ref[...] * inv_n - dm * dm, 0.0)
                scale = g_ref[...] * lax.rsqrt(var + BN_EPS)
                s0_ref[...] = scale                         # reuse scratch: fused scale
                s1_ref[...] = bta_ref[...] - mean * scale   # reuse scratch: fused shift

        @pl.when(p == 1)
        def _apply():
            y = z * s0_ref[...] + s1_ref[...]               # one FMA per element
            y_ref[...] = jnp.maximum(y, 0.0).astype(y_ref.dtype)

    # Output blocks are only written in phase 1.  The `i * p` index map keeps a
    # single resident (never flushed) output block throughout phase 0, so no
    # uninitialized data is ever written back to HBM and each output block is
    # DMA'd to HBM exactly once, right after phase 1 produces it.
    return pl.pallas_call(
        kernel,
        out_shape=jax.ShapeDtypeStruct((B, Cout), out_dtype),
        grid=(2, nt),
        in_specs=[
            pl.BlockSpec((tb, Cin), lambda p, i: (i, 0)),     # x, native layout
            pl.BlockSpec((Cout, Cin), lambda p, i: (0, 0)),   # weight, resident
            pl.BlockSpec((1, Cout), lambda p, i: (0, 0)),     # gamma
            pl.BlockSpec((1, Cout), lambda p, i: (0, 0)),     # beta
        ],
        out_specs=pl.BlockSpec((tb, Cout), lambda p, i: (i * p, 0)),
        scratch_shapes=[
            pltpu.VMEM((1, Cout), jnp.float32),   # pivot
            pltpu.VMEM((1, Cout), jnp.float32),   # sum(d)   -> fused scale
            pltpu.VMEM((1, Cout), jnp.float32),   # sum(d*d) -> fused shift
        ],
        compiler_params=pltpu.CompilerParams(
            # Both axes carry sequential dependence through the persistent stats
            # scratch -> "arbitrary" (core-safe on v7x megacore).
            dimension_semantics=("arbitrary", "arbitrary"),
            vmem_limit_bytes=48 * 1024 * 1024,
        ),
    )(x, weight, g2, b2)


def _reference(x, weight, bias, gamma, beta):
    """Plain-JAX reference mirroring PyTorch DenseBlock (train-mode BN + ReLU)."""
    y = x @ weight.T + bias
    mean = jnp.mean(y, axis=0)
    var = jnp.mean((y - mean) ** 2, axis=0)
    y = (y - mean) * lax.rsqrt(var + BN_EPS)
    y = y * gamma + beta
    return jnp.maximum(y, 0.0)


if __name__ == "__main__":
    # DenseBlock(in_channels=16, out_channels=32) defaults: bias=True,
    # activation='relu', norm='batch'.  Batch chosen not-multiple-of-8/128 so the
    # ragged-tile masking path is exercised.
    B, Cin, Cout = 300, 16, 32

    key = jax.random.PRNGKey(0)
    kx, kw, kb, kg, kbeta = jax.random.split(key, 5)
    x = jax.random.normal(kx, (B, Cin), dtype=jnp.float32)
    weight = jax.random.normal(kw, (Cout, Cin), dtype=jnp.float32) / jnp.sqrt(float(Cin))
    bias = jax.random.normal(kb, (Cout,), dtype=jnp.float32) * 0.1
    gamma = 1.0 + 0.1 * jax.random.normal(kg, (Cout,), dtype=jnp.float32)
    beta = 0.1 * jax.random.normal(kbeta, (Cout,), dtype=jnp.float32)

    ref = jax.block_until_ready(_reference(x, weight, bias, gamma, beta))

    # Default (large-tile) path: single ragged tile for this small demo.
    out = jax.block_until_ready(dense_block_forward(x, weight, bias, gamma, beta))
    assert out.shape == (B, Cout), out.shape
    err = float(jnp.max(jnp.abs(out - ref)))
    assert jnp.allclose(out, ref, atol=1e-4, rtol=1e-4), err

    # Multi-tile path (coverage of cross-tile stats accumulation + ragged last
    # tile); the small block_b here is for correctness coverage only — the
    # performance default stays large.
    out2 = jax.block_until_ready(
        dense_block_forward(x, weight, bias, gamma, beta, block_b=128))
    err2 = float(jnp.max(jnp.abs(out2 - ref)))
    assert jnp.allclose(out2, ref, atol=1e-4, rtol=1e-4), err2

    print("KERNEL_OK")
</pallas_src>

<mosaic_0001>
module attributes {stable_mosaic.version = 11 : i64} {
  func.func @kernel(%arg0: i32, %arg1: i32, %arg2: memref<304x16xf32, #tpu.memory_space<vmem>>, %arg3: memref<32x16xf32, #tpu.memory_space<vmem>>, %arg4: memref<1x32xf32, #tpu.memory_space<vmem>>, %arg5: memref<1x32xf32, #tpu.memory_space<vmem>>, %arg6: memref<304x32xf32, #tpu.memory_space<vmem>>, %arg7: memref<1x32xf32, #tpu.memory_space<vmem>>, %arg8: memref<1x32xf32, #tpu.memory_space<vmem>>, %arg9: memref<1x32xf32, #tpu.memory_space<vmem>>) attributes {dimension_semantics = [#tpu.dimension_semantics<arbitrary>, #tpu.dimension_semantics<arbitrary>], iteration_bounds = array<i64: 2, 1>, scalar_prefetch = 0 : i64, scratch_operands = 3 : i64, tpu.core_type = #tpu.core_type<tc>, window_params = [{transform_indices = @transform_0, window_bounds = array<i64: 304, 16>}, {pipeline_mode = #tpu.pipeline_mode<synchronous>, transform_indices = @transform_1, window_bounds = array<i64: 32, 16>}, {pipeline_mode = #tpu.pipeline_mode<synchronous>, transform_indices = @transform_2, window_bounds = array<i64: 1, 32>}, {pipeline_mode = #tpu.pipeline_mode<synchronous>, transform_indices = @transform_3, window_bounds = array<i64: 1, 32>}, {transform_indices = @transform_4, window_bounds = array<i64: 304, 32>}]} {
    %c0 = arith.constant 0 : index
    %c0_0 = arith.constant 0 : index
    %0 = vector.load %arg2[%c0, %c0_0] : memref<304x16xf32, #tpu.memory_space<vmem>>, vector<304x16xf32>
    %c0_1 = arith.constant 0 : index
    %c0_2 = arith.constant 0 : index
    %1 = vector.load %arg3[%c0_1, %c0_2] : memref<32x16xf32, #tpu.memory_space<vmem>>, vector<32x16xf32>
    %cst = arith.constant dense<0.000000e+00> : vector<304x32xf32>
    %2 = tpu.matmul %0, %1, %cst {dimension_numbers = #tpu.dot_dimension_numbers<[1], [1], [0], [0], [0, 0, 1, 0], [], []>} : vector<304x16xf32>, vector<32x16xf32>, vector<304x32xf32> -> vector<304x32xf32>
    %c0_i32 = arith.constant 0 : i32
    %3 = arith.cmpi eq, %arg0, %c0_i32 : i32
    %4 = arith.extui %3 : i1 to i32
    %c0_i32_3 = arith.constant 0 : i32
    %5 = arith.cmpi ne, %4, %c0_i32_3 : i32
    scf.if %5 {
      %9 = tpu.iota {dimensions = array<i32: 0>} : vector<304x32xi32>
      %c304_i32 = arith.constant 304 : i32
      %10 = arith.muli %arg1, %c304_i32 : i32
      %11 = vector.broadcast %10 : i32 to vector<304x32xi32>
      %12 = arith.addi %9, %11 : vector<304x32xi32>
      %c300_i32 = arith.constant 300 : i32
      %13 = vector.broadcast %c300_i32 : i32 to vector<304x32xi32>
      %14 = arith.cmpi slt, %12, %13 : vector<304x32xi32>
      %c0_i32_5 = arith.constant 0 : i32
      %15 = arith.cmpi eq, %arg1, %c0_i32_5 : i32
      %16 = arith.extui %15 : i1 to i32
      %c0_i32_6 = arith.constant 0 : i32
      %17 = arith.cmpi ne, %16, %c0_i32_6 : i32
      scf.if %17 {
        %cst_22 = arith.constant 0.000000e+00 : f32
        %37 = vector.broadcast %cst_22 : f32 to vector<304x32xf32>
        %38 = arith.select %14, %2, %37 : vector<304x32xi1>, vector<304x32xf32>
        %cst_23 = arith.constant dense<0.000000e+00> : vector<32xf32>
        %39 = vector.multi_reduction <add>, %38, %cst_23 [0] : vector<304x32xf32> to vector<32xf32>
        %40 = vector.shape_cast %39 : vector<32xf32> to vector<1x32xf32>
        %cst_24 = arith.constant 0.00333333341 : f32
        %41 = vector.broadcast %cst_24 : f32 to vector<1x32xf32>
        %42 = arith.mulf %40, %41 : vector<1x32xf32>
        %c0_25 = arith.constant 0 : index
        %c0_26 = arith.constant 0 : index
        %43 = vector.load %arg7[%c0_25, %c0_26] : memref<1x32xf32, #tpu.memory_space<vmem>>, vector<1x32xf32>
        tpu.vector_store %arg7[%c0_25, %c0_26], %42 {strides = array<i32>} : memref<1x32xf32, #tpu.memory_space<vmem>>, vector<1x32xf32>,
        %cst_27 = arith.constant 0.000000e+00 : f32
        %44 = vector.broadcast %cst_27 : f32 to vector<1x32xf32>
        %c0_28 = arith.constant 0 : index
        %c0_29 = arith.constant 0 : index
        %45 = vector.load %arg8[%c0_28, %c0_29] : memref<1x32xf32, #tpu.memory_space<vmem>>, vector<1x32xf32>
        tpu.vector_store %arg8[%c0_28, %c0_29], %44 {strides = array<i32>} : memref<1x32xf32, #tpu.memory_space<vmem>>, vector<1x32xf32>,
        %cst_30 = arith.constant 0.000000e+00 : f32
        %46 = vector.broadcast %cst_30 : f32 to vector<1x32xf32>
        %c0_31 = arith.constant 0 : index
        %c0_32 = arith.constant 0 : index
        %47 = vector.load %arg9[%c0_31, %c0_32] : memref<1x32xf32, #tpu.memory_space<vmem>>, vector<1x32xf32>
        tpu.vector_store %arg9[%c0_31, %c0_32], %46 {strides = array<i32>} : memref<1x32xf32, #tpu.memory_space<vmem>>, vector<1x32xf32>,
      } else {
      }
      %c0_7 = arith.constant 0 : index
      %c0_8 = arith.constant 0 : index
      %18 = vector.load %arg7[%c0_7, %c0_8] : memref<1x32xf32, #tpu.memory_space<vmem>>, vector<1x32xf32>
      %19 = vector.broadcast %18 : vector<1x32xf32> to vector<304x32xf32>
      %20 = arith.subf %2, %19 : vector<304x32xf32>
      %cst_9 = arith.constant 0.000000e+00 : f32
      %21 = vector.broadcast %cst_9 : f32 to vector<304x32xf32>
      %22 = arith.select %14, %20, %21 : vector<304x32xi1>, vector<304x32xf32>
      %c0_10 = arith.constant 0 : index
      %c0_11 = arith.constant 0 : index
      %23 = vector.load %arg8[%c0_10, %c0_11] : memref<1x32xf32, #tpu.memory_space<vmem>>, vector<1x32xf32>
      %cst_12 = arith.constant dense<0.000000e+00> : vector<32xf32>
      %24 = vector.multi_reduction <add>, %22, %cst_12 [0] : vector<304x32xf32> to vector<32xf32>
      %25 = vector.shape_cast %24 : vector<32xf32> to vector<1x32xf32>
      %26 = arith.addf %23, %25 : vector<1x32xf32>
      %c0_13 = arith.constant 0 : index
      %c0_14 = arith.constant 0 : index
      %27 = vector.load %arg8[%c0_13, %c0_14] : memref<1x32xf32, #tpu.memory_space<vmem>>, vector<1x32xf32>
      tpu.vector_store %arg8[%c0_13, %c0_14], %26 {strides = array<i32>} : memref<1x32xf32, #tpu.memory_space<vmem>>, vector<1x32xf32>,
      %c0_15 = arith.constant 0 : index
      %c0_16 = arith.constant 0 : index
      %28 = vector.load %arg9[%c0_15, %c0_16] : memref<1x32xf32, #tpu.memory_space<vmem>>, vector<1x32xf32>
      %29 = arith.mulf %22, %22 : vector<304x32xf32>
      %cst_17 = arith.constant dense<0.000000e+00> : vector<32xf32>
      %30 = vector.multi_reduction <add>, %29, %cst_17 [0] : vector<304x32xf32> to vector<32xf32>
      %31 = vector.shape_cast %30 : vector<32xf32> to vector<1x32xf32>
      %32 = arith.addf %28, %31 : vector<1x32xf32>
      %c0_18 = arith.constant 0 : index
      %c0_19 = arith.constant 0 : index
      %33 = vector.load %arg9[%c0_18, %c0_19] : memref<1x32xf32, #tpu.memory_space<vmem>>, vector<1x32xf32>
      tpu.vector_store %arg9[%c0_18, %c0_19], %32 {strides = array<i32>} : memref<1x32xf32, #tpu.memory_space<vmem>>, vector<1x32xf32>,
      %c0_i32_20 = arith.constant 0 : i32
      %34 = arith.cmpi eq, %arg1, %c0_i32_20 : i32
      %35 = arith.extui %34 : i1 to i32
      %c0_i32_21 = arith.constant 0 : i32
      %36 = arith.cmpi ne, %35, %c0_i32_21 : i32
      scf.if %36 {
        %c0_22 = arith.constant 0 : index
        %c0_23 = arith.constant 0 : index
        %37 = vector.load %arg8[%c0_22, %c0_23] : memref<1x32xf32, #tpu.memory_space<vmem>>, vector<1x32xf32>
        %cst_24 = arith.constant 0.00333333341 : f32
        %38 = vector.broadcast %cst_24 : f32 to vector<1x32xf32>
        %39 = arith.mulf %37, %38 : vector<1x32xf32>
        %c0_25 = arith.constant 0 : index
        %c0_26 = arith.constant 0 : index
        %40 = vector.load %arg7[%c0_25, %c0_26] : memref<1x32xf32, #tpu.memory_space<vmem>>, vector<1x32xf32>
        %41 = arith.addf %40, %39 : vector<1x32xf32>
        %c0_27 = arith.constant 0 : index
        %c0_28 = arith.constant 0 : index
        %42 = vector.load %arg9[%c0_27, %c0_28] : memref<1x32xf32, #tpu.memory_space<vmem>>, vector<1x32xf32>
        %cst_29 = arith.constant 0.00333333341 : f32
        %43 = vector.broadcast %cst_29 : f32 to vector<1x32xf32>
        %44 = arith.mulf %42, %43 : vector<1x32xf32>
        %45 = arith.mulf %39, %39 : vector<1x32xf32>
        %46 = arith.subf %44, %45 : vector<1x32xf32>
        %cst_30 = arith.constant 0.000000e+00 : f32
        %47 = vector.broadcast %cst_30 : f32 to vector<1x32xf32>
        %48 = arith.maximumf %46, %47 : vector<1x32xf32>
        %c0_31 = arith.constant 0 : index
        %c0_32 = arith.constant 0 : index
        %49 = vector.load %arg4[%c0_31, %c0_32] : memref<1x32xf32, #tpu.memory_space<vmem>>, vector<1x32xf32>
        %cst_33 = arith.constant 9.99999974E-6 : f32
        %50 = vector.broadcast %cst_33 : f32 to vector<1x32xf32>
        %51 = arith.addf %48, %50 : vector<1x32xf32>
        %52 = math.rsqrt %51 : vector<1x32xf32>
        %53 = arith.mulf %49, %52 : vector<1x32xf32>
        %c0_34 = arith.constant 0 : index
        %c0_35 = arith.constant 0 : index
        %54 = vector.load %arg8[%c0_34, %c0_35] : memref<1x32xf32, #tpu.memory_space<vmem>>, vector<1x32xf32>
        tpu.vector_store %arg8[%c0_34, %c0_35], %53 {strides = array<i32>} : memref<1x32xf32, #tpu.memory_space<vmem>>, vector<1x32xf32>,
        %c0_36 = arith.constant 0 : index
        %c0_37 = arith.constant 0 : index
        %55 = vector.load %arg5[%c0_36, %c0_37] : memref<1x32xf32, #tpu.memory_space<vmem>>, vector<1x32xf32>
        %56 = arith.mulf %41, %53 : vector<1x32xf32>
        %57 = arith.subf %55, %56 : vector<1x32xf32>
        %c0_38 = arith.constant 0 : index
        %c0_39 = arith.constant 0 : index
        %58 = vector.load %arg9[%c0_38, %c0_39] : memref<1x32xf32, #tpu.memory_space<vmem>>, vector<1x32xf32>
        tpu.vector_store %arg9[%c0_38, %c0_39], %57 {strides = array<i32>} : memref<1x32xf32, #tpu.memory_space<vmem>>, vector<1x32xf32>,
      } else {
      }
    } else {
    }
    %c1_i32 = arith.constant 1 : i32
    %6 = arith.cmpi eq, %arg0, %c1_i32 : i32
    %7 = arith.extui %6 : i1 to i32
    %c0_i32_4 = arith.constant 0 : i32
    %8 = arith.cmpi ne, %7, %c0_i32_4 : i32
    scf.if %8 {
      %c0_5 = arith.constant 0 : index
      %c0_6 = arith.constant 0 : index
      %9 = vector.load %arg8[%c0_5, %c0_6] : memref<1x32xf32, #tpu.memory_space<vmem>>, vector<1x32xf32>
      %10 = vector.broadcast %9 : vector<1x32xf32> to vector<304x32xf32>
      %11 = arith.mulf %2, %10 : vector<304x32xf32>
      %c0_7 = arith.constant 0 : index
      %c0_8 = arith.constant 0 : index
      %12 = vector.load %arg9[%c0_7, %c0_8] : memref<1x32xf32, #tpu.memory_space<vmem>>, vector<1x32xf32>
      %13 = vector.broadcast %12 : vector<1x32xf32> to vector<304x32xf32>
      %14 = arith.addf %11, %13 : vector<304x32xf32>
      %cst_9 = arith.constant 0.000000e+00 : f32
      %15 = vector.broadcast %cst_9 : f32 to vector<304x32xf32>
      %16 = arith.maximumf %14, %15 : vector<304x32xf32>
      %c0_10 = arith.constant 0 : index
      %c0_11 = arith.constant 0 : index
      %17 = vector.load %arg6[%c0_10, %c0_11] : memref<304x32xf32, #tpu.memory_space<vmem>>, vector<304x32xf32>
      tpu.vector_store %arg6[%c0_10, %c0_11], %16 {strides = array<i32>} : memref<304x32xf32, #tpu.memory_space<vmem>>, vector<304x32xf32>,
    } else {
    }
    return
  }
  func.func @transform_0(%arg0: i32, %arg1: i32) -> (i32, i32) {
    %c0_i32 = arith.constant 0 : i32
    %c0_i32_0 = arith.constant 0 : i32
    return %arg1, %c0_i32 : i32, i32
  }
  func.func @transform_1(%arg0: i32, %arg1: i32) -> (i32, i32) {
    %c0_i32 = arith.constant 0 : i32
    %c0_i32_0 = arith.constant 0 : i32
    %c0_i32_1 = arith.constant 0 : i32
    return %c0_i32, %c0_i32_0 : i32, i32
  }
  func.func @transform_2(%arg0: i32, %arg1: i32) -> (i32, i32) {
    %c0_i32 = arith.constant 0 : i32
    %c0_i32_0 = arith.constant 0 : i32
    %c0_i32_1 = arith.constant 0 : i32
    return %c0_i32, %c0_i32_0 : i32, i32
  }
  func.func @transform_3(%arg0: i32, %arg1: i32) -> (i32, i32) {
    %c0_i32 = arith.constant 0 : i32
    %c0_i32_0 = arith.constant 0 : i32
    %c0_i32_1 = arith.constant 0 : i32
    return %c0_i32, %c0_i32_0 : i32, i32
  }
  func.func @transform_4(%arg0: i32, %arg1: i32) -> (i32, i32) {
    %0 = arith.muli %arg1, %arg0 : i32
    %c0_i32 = arith.constant 0 : i32
    %c0_i32_0 = arith.constant 0 : i32
    return %0, %c0_i32 : i32, i32
  }
}

</mosaic_0001>

<bundles_post_ra>
// kernel: tpu_custom_call.1
= control target key start
LH: loop header
LB: loop body
LE: loop exit
PB: predicated region body
PF: predicated region fallthrough
CT: control target
= control target key end

     0   :  { %s1702_s15 = smov 0   ;;  %s1704_s16 = smov 0   ;;  %s2580_s0 = inlined_call_operand.vmem [shape: f32[300,16], index: 0, kind: input, shape index: {}]   ;;  %s2581_s1 = inlined_call_operand.vmem [shape: f32[32,16], index: 1, kind: input, shape index: {}]   ;;  %s2582_s2 = inlined_call_operand.vmem [shape: f32[1,32], index: 2, kind: input, shape index: {}]   ;;  %s2583_s3 = inlined_call_operand.vmem [shape: f32[1,32], index: 3, kind: input, shape index: {}]   ;;  %s2584_s4 = inlined_call_operand.vmem [shape: f32[300,32], index: 4, kind: output, shape index: {}]  }
   0x1   :  { %s1706_s17 = smov 0  }
   0x2 LB: > { %s26_s18 = sadd.s32 1, %s1670_s16  ;;  %p1450_p0 = scmp.ge.s32.totalorder %s1674_s17, 1  ;;  %s1674_s17 = sphi %s1706_s17, %s14_s17   ;;  %s1670_s16 = sphi %s1704_s16, %s2598_s16   ;;  %s1666_s15 = sphi %s1702_s15, %s2597_s15  }
   0x3   : > { %p28_p1 = scmp.ge.s32.totalorder %s26_s18, 2  ;;  %p177_p2 = scmp.lt.s32.totalorder %s1674_s17, 3 }
   0x5   : > { %s2600_s18 = smov (%p28_p1, %s26_s18), 0  ;;  %p178_p3 = pnand %p1450_p0, %p177_p2 }
   0x7   : > { %181 = sbr.rel (%p178_p3) target bundleno = 526 (0x20e), region = 36 }
   0xe   : > { %v256_v0 = vld [vmem:[%s2581_s1] sm:$0xff]  ;;  %v257_v1 = vld [vmem:[%s2581_s1 + $0x8] sm:$0xff]  ;;  %vm260_vm0 = vcmask 130048   ;;  %v258_v2 = vld [vmem:[%s2581_s1 + $0x10] sm:$0xff]  ;;  %p1493_p4 = scmp.ne.s32.totalorder %s1666_s15, 0 }
   0xf   : > { %v1609_v3 = vpack.c.bf16 %v257_v1, %v256_v0  ;;  %vm1610_vm1 = vmpackc.low %vm260_vm0, %vm260_vm0  ;;  %v259_v4 = vld [vmem:[%s2581_s1 + $0x18] sm:$0xff]  ;;  %v218_v5 = vld [vmem:[%s2580_s0] sm:$0xff]  ;;  %vm805_vm2 = vcmask (!%p1493_p4), 261120   ;;  %vm888_vm3 = vcmask (!%p1493_p4), 253952  }
  0x10   : > { %v1615_v6 = vpack.c.bf16 %v259_v4, %v258_v2  ;;  %1552 = vmatprep.mubr.msk.f32.mxu0 %vm260_vm0, %v218_v5  ;;  %v238_v7 = vld [vmem:[%s2580_s0 + $0xa0] sm:$0xff]  ;;  %v219_v8 = vld [vmem:[%s2580_s0 + $0x8] sm:$0xff]  ;;  %v220_v10 = vld [vmem:[%s2580_s0 + $0x10] sm:$0xff] }
  0x11   : > { %1611 = vmatprep.subr.msk.bf16.mxu0 %vm1610_vm1, %v1609_v3  ;;  %1621 = vmatprep.subr.msk.bf16.mxu1 %vm1610_vm1, %v1609_v3  ;;  %v239_v9 = vld [vmem:[%s2580_s0 + $0xa8] sm:$0xff]  ;;  %v240_v11 = vld [vmem:[%s2580_s0 + $0xb0] sm:$0xff]  ;;  %v221_v12 = vld [vmem:[%s2580_s0 + $0x18] sm:$0xff] }
  0x12   : > { %1614 = vmatpush3.bf16.xpose.msk.msra.mxu0 %vm1610_vm1, %v1609_v3  ;;  %1623 = vmatpush3.bf16.xpose.msk.msra.mxu1 %vm1610_vm1, %v1609_v3  ;;  %v241_v13 = vld [vmem:[%s2580_s0 + $0xb8] sm:$0xff]  ;;  %v222_v14 = vld [vmem:[%s2580_s0 + $0x20] sm:$0xff]  ;;  %v223_v16 = vld [vmem:[%s2580_s0 + $0x28] sm:$0xff] }
  0x13   : > { %1617 = vmatprep.subr.msk.bf16.mxu0 %vm1610_vm1, %v1615_v6  ;;  %1622 = vmatprep.subr.msk.bf16.mxu1 %vm1610_vm1, %v1615_v6  ;;  %v242_v15 = vld [vmem:[%s2580_s0 + $0xc0] sm:$0xff]  ;;  %v243_v17 = vld [vmem:[%s2580_s0 + $0xc8] sm:$0xff]  ;;  %v224_v18 = vld [vmem:[%s2580_s0 + $0x30] sm:$0xff] }
  0x14   : > { %1582 = vmatprep.mubr.msk.f32.mxu1 %vm260_vm0, %v238_v7  ;;  %v244_v19 = vld [vmem:[%s2580_s0 + $0xd0] sm:$0xff]  ;;  %v225_v20 = vld [vmem:[%s2580_s0 + $0x38] sm:$0xff]  ;;  %v226_v22 = vld [vmem:[%s2580_s0 + $0x40] sm:$0xff] }
  0x15   : > { %v245_v21 = vld [vmem:[%s2580_s0 + $0xd8] sm:$0xff]  ;;  %v246_v23 = vld [vmem:[%s2580_s0 + $0xe0] sm:$0xff]  ;;  %v227_v24 = vld [vmem:[%s2580_s0 + $0x48] sm:$0xff] }
  0x16   : > { %v247_v25 = vld [vmem:[%s2580_s0 + $0xe8] sm:$0xff]  ;;  %v228_v26 = vld [vmem:[%s2580_s0 + $0x50] sm:$0xff]  ;;  %v229_v28 = vld [vmem:[%s2580_s0 + $0x58] sm:$0xff] }
  0x17   : > { %v248_v27 = vld [vmem:[%s2580_s0 + $0xf0] sm:$0xff]  ;;  %v249_v29 = vld [vmem:[%s2580_s0 + $0xf8] sm:$0xff]  ;;  %v230_v30 = vld [vmem:[%s2580_s0 + $0x60] sm:$0xff] }
  0x18   : > { %v250_v31 = vld [vmem:[%s2580_s0 + $0x100] sm:$0xff]  ;;  %v231_v32 = vld [vmem:[%s2580_s0 + $0x68] sm:$0xff]  ;;  %v232_v34 = vld [vmem:[%s2580_s0 + $0x70] sm:$0xff] }
  0x19   : > { %v251_v33 = vld [vmem:[%s2580_s0 + $0x108] sm:$0xff]  ;;  %v252_v35 = vld [vmem:[%s2580_s0 + $0x110] sm:$0xff]  ;;  %v233_v36 = vld [vmem:[%s2580_s0 + $0x78] sm:$0xff] }
  0x1a   : > { %1620 = vmatpush3.bf16.xpose.msk.msra.mxu0 %vm1610_vm1, %v1615_v6  ;;  %1624 = vmatpush3.bf16.xpose.msk.msra.mxu1 %vm1610_vm1, %v1615_v6  ;;  %v253_v37 = vld [vmem:[%s2580_s0 + $0x118] sm:$0xff]  ;;  %v234_v38 = vld [vmem:[%s2580_s0 + $0x80] sm:$0xff]  ;;  %v235_v40 = vld [vmem:[%s2580_s0 + $0x88] sm:$0xff] }
  0x1b   : > { %v254_v39 = vld [vmem:[%s2580_s0 + $0x120] sm:$0xff]  ;;  %v255_v41 = vld [vmem:[%s2580_s0 + $0x128] sm:$0xff]  ;;  %v236_v42 = vld [vmem:[%s2580_s0 + $0x90] sm:$0xff] }
  0x1c   : > { %v237_v43 = vld [vmem:[%s2580_s0 + $0x98] sm:$0xff] }
  0x21   : > { %1553 = vmatmul.mubr.msk.f32.vlgmr.msra.gmra.mrb[0].mxu0 %vm260_vm0, %v219_v8  ;;  %1583 = vmatmul.mubr.msk.f32.vlgmr.msra.gmra.mrb[0].mxu1 %vm260_vm0, %v239_v9 }
  0x22   : > { %1555 = vmatprep.mubr.msk.f32.mxu0 %vm260_vm0, %v220_v10  ;;  %1585 = vmatprep.mubr.msk.f32.mxu1 %vm260_vm0, %v240_v11 }
  0x25   : > { %1556 = vmatmul.mubr.msk.f32.gmra.mrb[2].mxu0 %vm260_vm0, %v221_v12  ;;  %1586 = vmatmul.mubr.msk.f32.gmra.mrb[2].mxu1 %vm260_vm0, %v241_v13 }
  0x26   : > { %1558 = vmatprep.mubr.msk.f32.mxu0 %vm260_vm0, %v222_v14  ;;  %1588 = vmatprep.mubr.msk.f32.mxu1 %vm260_vm0, %v242_v15 }
  0x29   : > { %1559 = vmatmul.mubr.msk.f32.gmra.mrb[4].mxu0 %vm260_vm0, %v223_v16  ;;  %1589 = vmatmul.mubr.msk.f32.gmra.mrb[4].mxu1 %vm260_vm0, %v243_v17 }
  0x2a   : > { %1561 = vmatprep.mubr.msk.f32.mxu0 %vm260_vm0, %v224_v18  ;;  %1591 = vmatprep.mubr.msk.f32.mxu1 %vm260_vm0, %v244_v19 }
  0x2d   : > { %1562 = vmatmul.mubr.msk.f32.gmra.mrb[6].mxu0 %vm260_vm0, %v225_v20  ;;  %1592 = vmatmul.mubr.msk.f32.gmra.mrb[6].mxu1 %vm260_vm0, %v245_v21  ;;  %v1676_v21 = vmov (!%p1493_p4), 0.0  }
  0x2e   : > { %1564 = vmatprep.mubr.msk.f32.mxu0 %vm260_vm0, %v226_v22  ;;  %1594 = vmatprep.mubr.msk.f32.mxu1 %vm260_vm0, %v246_v23  ;;  %890 = vst.msk [vmem:[#allocation3] sm:$0x1] (!%p1493_p4), %vm888_vm3, %v1676_v21  ;;  %891 = vst.msk [vmem:[#allocation4] sm:$0x1] (!%p1493_p4), %vm888_vm3, %v1676_v21 }
  0x31   : > { %1565 = vmatmul.mubr.msk.f32.gmra.mrb[8].mxu0 %vm260_vm0, %v227_v24  ;;  %1595 = vmatmul.mubr.msk.f32.gmra.mrb[8].mxu1 %vm260_vm0, %v247_v25 }
  0x32   : > { %1567 = vmatprep.mubr.msk.f32.mxu0 %vm260_vm0, %v228_v26  ;;  %1597 = vmatprep.mubr.msk.f32.mxu1 %vm260_vm0, %v248_v27 }
  0x35   : > { %1568 = vmatmul.mubr.msk.f32.gmra.mrb[10].mxu0 %vm260_vm0, %v229_v28  ;;  %1598 = vmatmul.mubr.msk.f32.gmra.mrb[10].mxu1 %vm260_vm0, %v249_v29 }
  0x36   : > { %1570 = vmatprep.mubr.msk.f32.mxu0 %vm260_vm0, %v230_v30  ;;  %1600 = vmatprep.mubr.msk.f32.mxu1 %vm260_vm0, %v250_v31 }
  0x39   : > { %1571 = vmatmul.mubr.msk.f32.gmra.mrb[12].mxu0 %vm260_vm0, %v231_v32  ;;  %1601 = vmatmul.mubr.msk.f32.gmra.mrb[12].mxu1 %vm260_vm0, %v251_v33 }
  0x3a   : > { %1573 = vmatprep.mubr.msk.f32.mxu0 %vm260_vm0, %v232_v34  ;;  %1603 = vmatprep.mubr.msk.f32.mxu1 %vm260_vm0, %v252_v35 }
  0x3d   : > { %1574 = vmatmul.mubr.msk.f32.gmra.mrb[14].mxu0 %vm260_vm0, %v233_v36  ;;  %1604 = vmatmul.mubr.msk.f32.gmra.mrb[14].mxu1 %vm260_vm0, %v253_v37 }
  0x3e   : > { %1576 = vmatprep.mubr.msk.f32.mxu0 %vm260_vm0, %v234_v38  ;;  %1606 = vmatprep.mubr.msk.f32.mxu1 %vm260_vm0, %v254_v39 }
  0x41   : > { %1577 = vmatmul.mubr.msk.f32.gmra.mrb[16].mxu0 %vm260_vm0, %v235_v40  ;;  %1607 = vmatmul.mubr.msk.f32.gmra.mrb[16].mxu1 %vm260_vm0, %v255_v41 }
  0x42   : > { %1579 = vmatprep.mubr.msk.f32.mxu0 %vm260_vm0, %v236_v42 }
  0x45   : > { %1580 = vmatmul.mubr.msk.f32.gmra.mrb[18].mxu0 %vm260_vm0, %v237_v43 }
  0xf4   : > { %v1888_v44 = vpop.f32.mrb[0].mxu0  ;;  %v1890_v45 = vpop.f32.mrb[0].mxu1 }
  0xf5   : > { %v1892_v46 = vpop.f32.mrb[1].mxu0  ;;  %v1894_v47 = vpop.f32.mrb[1].mxu1  ;;  %v807_v19 = vsel (!%p1493_p4), %vm805_vm2, %v1888_v44, 0.0 }
  0xf6   : > { %v806_v18 = vsel (!%p1493_p4), %vm805_vm2, %v1892_v46, 0.0 }
  0xf7   : > { %v808_v22 = vadd.f32 (!%p1493_p4), %v807_v19, %v806_v18 }
  0xf8   : > { %v1896_v48 = vpop.f32.mrb[2].mxu0  ;;  %v1898_v49 = vpop.f32.mrb[2].mxu1 }
  0xf9   : > { %v1900_v50 = vpop.f32.mrb[3].mxu0  ;;  %v1902_v51 = vpop.f32.mrb[3].mxu1  ;;  %v811_v23 = vsel (!%p1493_p4), %vm805_vm2, %v1896_v48, 0.0 }
  0xfa   : > { %v809_v20 = vsel (!%p1493_p4), %vm805_vm2, %v1900_v50, 0.0 }
  0xfb   : > { %v810_v24 = vadd.f32 (!%p1493_p4), %v809_v20, %v808_v22 }
  0xfc   : > { %v1904_v52 = vpop.f32.mrb[4].mxu0  ;;  %v1906_v53 = vpop.f32.mrb[4].mxu1 }
  0xfd   : > { %v1908_v54 = vpop.f32.mrb[5].mxu0  ;;  %v1910_v55 = vpop.f32.mrb[5].mxu1  ;;  %v812_v26 = vadd.f32 (!%p1493_p4), %v811_v23, %v810_v24  ;;  %v815_v27 = vsel (!%p1493_p4), %vm805_vm2, %v1904_v52, 0.0 }
  0xfe   : > { %v813_v25 = vsel (!%p1493_p4), %vm805_vm2, %v1908_v54, 0.0 }
  0xff   : > { %v814_v28 = vadd.f32 (!%p1493_p4), %v813_v25, %v812_v26 }
 0x100   : > { %v1912_v56 = vpop.f32.mrb[6].mxu0  ;;  %v1914_v57 = vpop.f32.mrb[6].mxu1 }
 0x101   : > { %v1916_v58 = vpop.f32.mrb[7].mxu0  ;;  %v1918_v59 = vpop.f32.mrb[7].mxu1  ;;  %v816_v30 = vadd.f32 (!%p1493_p4), %v815_v27, %v814_v28  ;;  %v819_v31 = vsel (!%p1493_p4), %vm805_vm2, %v1912_v56, 0.0 }
 0x102   : > { %v817_v29 = vsel (!%p1493_p4), %vm805_vm2, %v1916_v58, 0.0 }
 0x103   : > { %v818_v32 = vadd.f32 (!%p1493_p4), %v817_v29, %v816_v30 }
 0x104   : > { %v1920_v60 = vpop.f32.mrb[8].mxu0  ;;  %v1922_v61 = vpop.f32.mrb[8].mxu1 }
 0x105   : > { %v1924_v62 = vpop.f32.mrb[9].mxu0  ;;  %v1926_v63 = vpop.f32.mrb[9].mxu1  ;;  %v820_v34 = vadd.f32 (!%p1493_p4), %v819_v31, %v818_v32  ;;  %v823_v35 = vsel (!%p1493_p4), %vm805_vm2, %v1920_v60, 0.0  ;;  %v845_v31 = vsel (!%p1493_p4), %vm805_vm2, %v1894_v47, 0.0 }
 0x106   : > { %v821_v33 = vsel (!%p1493_p4), %vm805_vm2, %v1924_v62, 0.0 }
 0x107   : > { %v822_v36 = vadd.f32 (!%p1493_p4), %v821_v33, %v820_v34  ;;  %v847_v33 = vsel (!%p1493_p4), %vm805_vm2, %v1890_v45, 0.0 }
 0x108   : > { %v1928_v0 = vpop.f32.mrb[10].mxu0  ;;  %v1930_v1 = vpop.f32.mrb[10].mxu1 }
 0x109   : > { %2589 = vst [vmem:[#allocation5_spill] sm:$0xff] %v1928_v0  ;;  %v1932_v2 = vpop.f32.mrb[11].mxu0  ;;  %v1934_v3 = vpop.f32.mrb[11].mxu1  ;;  %v824_v38 = vadd.f32 (!%p1493_p4), %v823_v35, %v822_v36  ;;  %v827_v39 = vsel (!%p1493_p4), %vm805_vm2, %v1928_v0, 0.0  ;;  %v849_v35 = vsel (!%p1493_p4), %vm805_vm2, %v1902_v51, 0.0 }
 0x10a   : > { %2590 = vst [vmem:[#allocation6_spill] sm:$0xff] %v1932_v2  ;;  %v825_v37 = vsel (!%p1493_p4), %vm805_vm2, %v1932_v2, 0.0 }
 0x10b   : > { %v826_v40 = vadd.f32 (!%p1493_p4), %v825_v37, %v824_v38  ;;  %v851_v37 = vsel (!%p1493_p4), %vm805_vm2, %v1898_v49, 0.0 }
 0x10c   : > { %v1936_v4 = vpop.f32.mrb[12].mxu0  ;;  %v1938_v5 = vpop.f32.mrb[12].mxu1 }
 0x10d   : > { %2591 = vst [vmem:[#allocation7_spill] sm:$0xff] %v1936_v4  ;;  %v1940_v6 = vpop.f32.mrb[13].mxu0  ;;  %v1942_v7 = vpop.f32.mrb[13].mxu1  ;;  %v828_v42 = vadd.f32 (!%p1493_p4), %v827_v39, %v826_v40  ;;  %v831_v43 = vsel (!%p1493_p4), %vm805_vm2, %v1936_v4, 0.0  ;;  %v853_v39 = vsel (!%p1493_p4), %vm805_vm2, %v1910_v55, 0.0 }
 0x10e   : > { %v829_v41 = vsel (!%p1493_p4), %vm805_vm2, %v1940_v6, 0.0 }
 0x10f   : > { %v830_v18 = vadd.f32 (!%p1493_p4), %v829_v41, %v828_v42  ;;  %v855_v41 = vsel (!%p1493_p4), %vm805_vm2, %v1906_v53, 0.0 }
 0x110   : > { %v1944_v8 = vpop.f32.mrb[14].mxu0  ;;  %v1946_v9 = vpop.f32.mrb[14].mxu1 }
 0x111   : > { %v1948_v10 = vpop.f32.mrb[15].mxu0  ;;  %v1950_v11 = vpop.f32.mrb[15].mxu1  ;;  %v832_v20 = vadd.f32 (!%p1493_p4), %v831_v43, %v830_v18  ;;  %v835_v21 = vsel (!%p1493_p4), %vm805_vm2, %v1944_v8, 0.0  ;;  %v857_v43 = vsel (!%p1493_p4), %vm805_vm2, %v1918_v59, 0.0 }
 0x112   : > { %2592 = vst [vmem:[#allocation8_spill] sm:$0xff] %v1948_v10  ;;  %v833_v19 = vsel (!%p1493_p4), %vm805_vm2, %v1948_v10, 0.0 }
 0x113   : > { %645 = sbr.rel (%p1493_p4) target bundleno = 488 (0x1e8), region = 40  ;;  %v834_v22 = vadd.f32 (!%p1493_p4), %v833_v19, %v832_v20  ;;  %v859_v19 = vsel (!%p1493_p4), %vm805_vm2, %v1914_v57, 0.0 }
 0x114   : > { %v1952_v12 = vpop.f32.mrb[16].mxu0  ;;  %v1954_v13 = vpop.f32.mrb[16].mxu1 }
 0x115   : > { %v1956_v14 = vpop.f32.mrb[17].mxu0  ;;  %v1958_v15 = vpop.f32.mrb[17].mxu1  ;;  %v836_v24 = vadd.f32 (!%p1493_p4), %v835_v21, %v834_v22  ;;  %v839_v25 = vsel (!%p1493_p4), %vm805_vm2, %v1952_v12, 0.0  ;;  %v646_v21 = vlaneseq (!%p1493_p4)  ;;  %v861_v22 = vsel (!%p1493_p4), %vm805_vm2, %v1926_v63, 0.0 }
 0x116   : > { %v837_v23 = vsel (!%p1493_p4), %vm805_vm2, %v1956_v14, 0.0 }
 0x117   : > { %v838_v26 = vadd.f32 (!%p1493_p4), %v837_v23, %v836_v24  ;;  %v863_v24 = vsel (!%p1493_p4), %vm805_vm2, %v1922_v61, 0.0 }
 0x118   : > { %v1960_v16 = vpop.f32.mrb[18].mxu0 }
 0x119   : > { %v1962_v17 = vpop.f32.mrb[19].mxu0  ;;  %v840_v28 = vadd.f32 (!%p1493_p4), %v839_v25, %v838_v26  ;;  %v843_v29 = vsel (!%p1493_p4), %vm805_vm2, %v1960_v16, 0.0  ;;  %v647_v26 = vshrl.u32 (!%p1493_p4), %v646_v21, 7 }
 0x11a   : > { %v841_v27 = vsel %vm805_vm2, %v1962_v17, 0.0 }
 0x11b   : > { %v842_v30 = vadd.f32 %v841_v27, %v840_v28  ;;  %v865_v27 = vsel %vm805_vm2, %v1934_v3, 0.0 }
 0x11d   : > { %v844_v32 = vadd.f32 %v843_v29, %v842_v30  ;;  %v867_v29 = vsel %vm805_vm2, %v1930_v1, 0.0 }
 0x11f   : > { %v846_v34 = vadd.f32 %v845_v31, %v844_v32  ;;  %v2031_v31 = vadd.s32 296, %v647_v26  ;;  %v869_v32 = vsel %vm805_vm2, %v1942_v7, 0.0 }
 0x121   : > { %v848_v36 = vadd.f32 %v847_v33, %v846_v34  ;;  %v871_v34 = vsel %vm805_vm2, %v1938_v5, 0.0  ;;  %vm762_vm4 = vcmp.lt.s32.totalorder %v2031_v31, 300 }
 0x123   : > { %v850_v38 = vadd.f32 %v849_v35, %v848_v36  ;;  %v873_v36 = vsel %vm805_vm2, %v1950_v11, 0.0 }
 0x125   : > { %v852_v40 = vadd.f32 %v851_v37, %v850_v38  ;;  %v875_v38 = vsel %vm805_vm2, %v1946_v9, 0.0 }
 0x127   : > { %v854_v42 = vadd.f32 %v853_v39, %v852_v40  ;;  %v804_v39 = vsel %vm762_vm4, %v1954_v13, 0.0 }
 0x129   : > { %v856_v18 = vadd.f32 %v855_v41, %v854_v42  ;;  %v877_v41 = vsel %vm805_vm2, %v1958_v15, 0.0 }
 0x12b   : > { %v858_v20 = vadd.f32 %v857_v43, %v856_v18  ;;  %v879_v43 = vsel %vm805_vm2, %v804_v39, 0.0 }
 0x12d   : > { %v860_v23 = vadd.f32 %v859_v19, %v858_v20 }
 0x12f   : > { %v862_v25 = vadd.f32 %v861_v22, %v860_v23 }
 0x131   : > { %v864_v28 = vadd.f32 %v863_v24, %v862_v25 }
 0x133   : > { %v866_v30 = vadd.f32 %v865_v27, %v864_v28 }
 0x135   : > { %v868_v33 = vadd.f32 %v867_v29, %v866_v30 }
 0x137   : > { %v870_v35 = vadd.f32 %v869_v32, %v868_v33 }
 0x139   : > { %v872_v37 = vadd.f32 %v871_v34, %v870_v35 }
 0x13b   : > { %v874_v40 = vadd.f32 %v873_v36, %v872_v37 }
 0x13d   : > { %v876_v42 = vadd.f32 %v875_v38, %v874_v40 }
 0x13f   : > { %v878_v18 = vadd.f32 %v877_v41, %v876_v42 }
 0x141   : > { %v880_v19 = vadd.f32 %v879_v43, %v878_v18 }
 0x143   : > { %v881_v20 = vrot.slane %v880_v19, 4 }
 0x145   : > { %v882_v21 = vadd.f32 %v881_v20, %v880_v19 }
 0x147   : > { %v883_v22 = vrot.slane %v882_v21, 2 }
 0x149   : > { %v884_v23 = vadd.f32 %v883_v22, %v882_v21 }
 0x14b   : > { %v885_v24 = vrot.slane %v884_v23, 1 }
 0x14d   : > { %v886_v25 = vadd.f32 %v885_v24, %v884_v23 }
 0x14f   : > { %v887_v26 = vmul.f32 0.0033333334, %v886_v25 }
 0x151   : > { %889 = vst.msk [vmem:[#allocation2] sm:$0x1] %vm888_vm3, %v887_v26 }
 0x158   : > { %v2049_v27 = vld [vmem:[#allocation2] ss:$0 sm:$0xff] }
 0x159   : > { %v899_v28 = vsub.f32 %v1892_v46, %v2049_v27  ;;  %v900_v29 = vsub.f32 %v1888_v44, %v2049_v27  ;;  %v901_v30 = vsub.f32 %v1900_v50, %v2049_v27  ;;  %v902_v32 = vsub.f32 %v1896_v48, %v2049_v27 }
 0x15a   : > { %v903_v36 = vsub.f32 %v1908_v54, %v2049_v27  ;;  %v904_v39 = vsub.f32 %v1904_v52, %v2049_v27  ;;  %v905_v42 = vsub.f32 %v1916_v58, %v2049_v27  ;;  %v906_v19 = vsub.f32 %v1912_v56, %v2049_v27 }
 0x15b   : > { %v977_v33 = vsel %vm805_vm2, %v899_v28, 0.0  ;;  %v978_v34 = vsel %vm805_vm2, %v900_v29, 0.0  ;;  %v980_v37 = vsel %vm805_vm2, %v901_v30, 0.0  ;;  %v982_v40 = vsel %vm805_vm2, %v902_v32, 0.0 }
 0x15c   : > { %v979_v35 = vadd.f32 %v978_v34, %v977_v33  ;;  %v984_v43 = vsel %vm805_vm2, %v903_v36, 0.0  ;;  %v986_v20 = vsel %vm805_vm2, %v904_v39, 0.0  ;;  %v907_v22 = vsub.f32 %v1924_v62, %v2049_v27 }
 0x15d   : > { %v988_v23 = vsel %vm805_vm2, %v905_v42, 0.0  ;;  %v908_v25 = vsub.f32 %v1920_v60, %v2049_v27  ;;  %v990_v26 = vsel %vm805_vm2, %v906_v19, 0.0  ;;  %v909_v34 = vsub.f32 %v1932_v2, %v2049_v27 }
 0x15e   : > { %v981_v38 = vadd.f32 %v980_v37, %v979_v35  ;;  %v992_v35 = vsel %vm805_vm2, %v907_v22, 0.0 }
 0x160   : > { %v983_v41 = vadd.f32 %v982_v40, %v981_v38  ;;  %v910_v38 = vsub.f32 %v1928_v0, %v2049_v27  ;;  %v994_v40 = vsel %vm805_vm2, %v908_v25, 0.0  ;;  %v1065_v0 = vmul.f32 %v902_v32, %v902_v32 }
 0x162   : > { %v985_v18 = vadd.f32 %v984_v43, %v983_v41  ;;  %v1062_v43 = vmul.f32 %v899_v28, %v899_v28 }
 0x164   : > { %v987_v21 = vadd.f32 %v986_v20, %v985_v18  ;;  %v1063_v18 = vmul.f32 %v900_v29, %v900_v29  ;;  %v911_v20 = vsub.f32 %v1940_v6, %v2049_v27  ;;  %v1100_v2 = vsel %vm805_vm2, %v1062_v43, 0.0 }
 0x165   : > { %v2097_v29 = vsub.f32 %v1948_v10, %v2049_v27  ;;  %v2110_v10 = vsub.f32 %v1956_v14, %v2049_v27 }
 0x166   : > { %v989_v24 = vadd.f32 %v988_v23, %v987_v21  ;;  %v996_v21 = vsel %vm805_vm2, %v909_v34, 0.0  ;;  %v1101_v28 = vsel %vm805_vm2, %v1063_v18, 0.0 }
 0x168   : > { %v991_v33 = vadd.f32 %v990_v26, %v989_v24  ;;  %v1064_v24 = vmul.f32 %v901_v30, %v901_v30  ;;  %v2090_v26 = vsub.f32 %v1936_v4, %v2049_v27  ;;  %v2103_v4 = vsub.f32 %v1944_v8, %v2049_v27 }
 0x16a   : > { %v993_v37 = vadd.f32 %v992_v35, %v991_v33  ;;  %v998_v33 = vsel %vm805_vm2, %v910_v38, 0.0  ;;  %v1002_v32 = vsel %vm805_vm2, %v2090_v26, 0.0 }
 0x16c   : > { %v995_v41 = vadd.f32 %v994_v40, %v993_v37  ;;  %v1000_v37 = vsel %vm805_vm2, %v911_v20, 0.0  ;;  %v1102_v40 = vadd.f32 %v1101_v28, %v1100_v2  ;;  %v1004_v2 = vsel %vm805_vm2, %v2097_v29, 0.0 }
 0x16e   : > { %v997_v23 = vadd.f32 %v996_v21, %v995_v41  ;;  %v1066_v41 = vmul.f32 %v903_v36, %v903_v36  ;;  %v1103_v21 = vsel %vm805_vm2, %v1064_v24, 0.0 }
 0x16f   : > { %v1104_v43 = vadd.f32 %v1103_v21, %v1102_v40 }
 0x170   : > { %v999_v35 = vadd.f32 %v998_v33, %v997_v23  ;;  %v1067_v23 = vmul.f32 %v904_v39, %v904_v39  ;;  %v1105_v33 = vsel %vm805_vm2, %v1065_v0, 0.0  ;;  %v1107_v28 = vsel %vm805_vm2, %v1066_v41, 0.0 }
 0x171   : > { %v1106_v36 = vadd.f32 %v1105_v33, %v1104_v43  ;;  %v1006_v39 = vsel %vm805_vm2, %v2103_v4, 0.0 }
 0x172   : > { %v1001_v30 = vadd.f32 %v1000_v37, %v999_v35  ;;  %v1068_v35 = vmul.f32 %v905_v42, %v905_v42  ;;  %v2117_v37 = vsub.f32 %v1952_v12, %v2049_v27  ;;  %v1109_v21 = vsel %vm805_vm2, %v1067_v23, 0.0 }
 0x173   : > { %v1108_v0 = vadd.f32 %v1107_v28, %v1106_v36  ;;  %v1008_v42 = vsel %vm805_vm2, %v2110_v10, 0.0 }
 0x174   : > { %v1003_v18 = vadd.f32 %v1002_v32, %v1001_v30  ;;  %v1069_v30 = vmul.f32 %v906_v19, %v906_v19  ;;  %v2124_v32 = vsub.f32 %v1962_v17, %v2049_v27  ;;  %v1111_v33 = vsel %vm805_vm2, %v1068_v35, 0.0 }
 0x175   : > { %v1110_v41 = vadd.f32 %v1109_v21, %v1108_v0  ;;  %v1010_v19 = vsel %vm805_vm2, %v2117_v37, 0.0 }
 0x176   : > { %v1005_v24 = vadd.f32 %v1004_v2, %v1003_v18  ;;  %v1070_v18 = vmul.f32 %v907_v22, %v907_v22  ;;  %v2131_v2 = vsub.f32 %v1960_v16, %v2049_v27  ;;  %v1113_v28 = vsel %vm805_vm2, %v1069_v30, 0.0 }
 0x177   : > { %v1112_v23 = vadd.f32 %v1111_v33, %v1110_v41  ;;  %v1012_v22 = vsel %vm805_vm2, %v2124_v32, 0.0 }
 0x178   : > { %v1007_v40 = vadd.f32 %v1006_v39, %v1005_v24  ;;  %v1071_v24 = vmul.f32 %v908_v25, %v908_v25  ;;  %v2138_v39 = vsub.f32 %v1894_v47, %v2049_v27  ;;  %v1115_v21 = vsel %vm805_vm2, %v1070_v18, 0.0 }
 0x179   : > { %v1114_v35 = vadd.f32 %v1113_v28, %v1112_v23  ;;  %v1014_v25 = vsel %vm805_vm2, %v2131_v2, 0.0 }
 0x17a   : > { %v1009_v43 = vadd.f32 %v1008_v42, %v1007_v40  ;;  %v1072_v40 = vmul.f32 %v909_v34, %v909_v34  ;;  %v2145_v42 = vsub.f32 %v1890_v45, %v2049_v27  ;;  %v1117_v33 = vsel %vm805_vm2, %v1071_v24, 0.0 }
 0x17b   : > { %v1116_v30 = vadd.f32 %v1115_v21, %v1114_v35  ;;  %v1016_v34 = vsel %vm805_vm2, %v2138_v39, 0.0 }
 0x17c   : > { %v1011_v36 = vadd.f32 %v1010_v19, %v1009_v43  ;;  %v1073_v43 = vmul.f32 %v910_v38, %v910_v38  ;;  %v2152_v19 = vsub.f32 %v1902_v51, %v2049_v27  ;;  %v1119_v28 = vsel %vm805_vm2, %v1072_v40, 0.0 }
 0x17d   : > { %v1118_v18 = vadd.f32 %v1117_v33, %v1116_v30  ;;  %v1018_v38 = vsel %vm805_vm2, %v2145_v42, 0.0 }
 0x17e   : > { %v1013_v0 = vadd.f32 %v1012_v22, %v1011_v36  ;;  %v1074_v36 = vmul.f32 %v911_v20, %v911_v20  ;;  %v2159_v22 = vsub.f32 %v1898_v49, %v2049_v27  ;;  %v1121_v21 = vsel %vm805_vm2, %v1073_v43, 0.0 }
 0x17f   : > { %v1120_v24 = vadd.f32 %v1119_v28, %v1118_v18  ;;  %v1020_v20 = vsel %vm805_vm2, %v2152_v19, 0.0 }
 0x180   : > { %v1015_v41 = vadd.f32 %v1014_v25, %v1013_v0  ;;  %v1075_v0 = vmul.f32 %v2090_v26, %v2090_v26  ;;  %v2168_v25 = vsub.f32 %v1910_v55, %v2049_v27  ;;  %v1123_v33 = vsel %vm805_vm2, %v1074_v36, 0.0 }
 0x181   : > { %v1122_v40 = vadd.f32 %v1121_v21, %v1120_v24  ;;  %v1022_v26 = vsel %vm805_vm2, %v2159_v22, 0.0 }
 0x182   : > { %v1017_v23 = vadd.f32 %v1016_v34, %v1015_v41  ;;  %v1076_v41 = vmul.f32 %v2097_v29, %v2097_v29  ;;  %v2177_v34 = vsub.f32 %v1906_v53, %v2049_v27  ;;  %v1125_v28 = vsel %vm805_vm2, %v1075_v0, 0.0 }
 0x183   : > { %v1124_v43 = vadd.f32 %v1123_v33, %v1122_v40  ;;  %v1024_v29 = vsel %vm805_vm2, %v2168_v25, 0.0 }
 0x184   : > { %v1019_v35 = vadd.f32 %v1018_v38, %v1017_v23  ;;  %v1077_v23 = vmul.f32 %v2103_v4, %v2103_v4  ;;  %v2186_v38 = vsub.f32 %v1918_v59, %v2049_v27  ;;  %v1127_v21 = vsel %vm805_vm2, %v1076_v41, 0.0 }
 0x185   : > { %v1126_v36 = vadd.f32 %v1125_v28, %v1124_v43  ;;  %v1026_v4 = vsel %vm805_vm2, %v2177_v34, 0.0 }
 0x186   : > { %v1021_v30 = vadd.f32 %v1020_v20, %v1019_v35  ;;  %v1078_v35 = vmul.f32 %v2110_v10, %v2110_v10  ;;  %v2195_v20 = vsub.f32 %v1914_v57, %v2049_v27  ;;  %v1129_v33 = vsel %vm805_vm2, %v1077_v23, 0.0 }
 0x187   : > { %v1128_v0 = vadd.f32 %v1127_v21, %v1126_v36  ;;  %v1028_v10 = vsel %vm805_vm2, %v2186_v38, 0.0 }
 0x188   : > { %v1023_v18 = vadd.f32 %v1022_v26, %v1021_v30  ;;  %v1079_v30 = vmul.f32 %v2117_v37, %v2117_v37  ;;  %v2204_v26 = vsub.f32 %v1926_v63, %v2049_v27  ;;  %v1131_v28 = vsel %vm805_vm2, %v1078_v35, 0.0 }
 0x189   : > { %v1130_v41 = vadd.f32 %v1129_v33, %v1128_v0  ;;  %v1030_v37 = vsel %vm805_vm2, %v2195_v20, 0.0 }
 0x18a   : > { %v1025_v24 = vadd.f32 %v1024_v29, %v1023_v18  ;;  %v1080_v18 = vmul.f32 %v2124_v32, %v2124_v32  ;;  %v2213_v29 = vsub.f32 %v1922_v61, %v2049_v27  ;;  %v1133_v21 = vsel %vm805_vm2, %v1079_v30, 0.0 }
 0x18b   : > { %v1132_v23 = vadd.f32 %v1131_v28, %v1130_v41  ;;  %v1032_v32 = vsel %vm805_vm2, %v2204_v26, 0.0 }
 0x18c   : > { %v1027_v40 = vadd.f32 %v1026_v4, %v1025_v24  ;;  %v1081_v24 = vmul.f32 %v2131_v2, %v2131_v2  ;;  %v929_v4 = vsub.f32 %v1934_v3, %v2049_v27  ;;  %v1135_v33 = vsel %vm805_vm2, %v1080_v18, 0.0 }
 0x18d   : > { %v1134_v35 = vadd.f32 %v1133_v21, %v1132_v23  ;;  %v1034_v2 = vsel %vm805_vm2, %v2213_v29, 0.0 }
 0x18e   : > { %v1029_v43 = vadd.f32 %v1028_v10, %v1027_v40  ;;  %v1082_v40 = vmul.f32 %v2138_v39, %v2138_v39  ;;  %v930_v10 = vsub.f32 %v1930_v1, %v2049_v27  ;;  %v1137_v28 = vsel %vm805_vm2, %v1081_v24, 0.0 }
 0x18f   : > { %v1136_v30 = vadd.f32 %v1135_v33, %v1134_v35  ;;  %v1036_v39 = vsel %vm805_vm2, %v929_v4, 0.0  ;;  %v1085_v24 = vmul.f32 %v2159_v22, %v2159_v22 }
 0x190   : > { %v1031_v36 = vadd.f32 %v1030_v37, %v1029_v43  ;;  %v1083_v43 = vmul.f32 %v2145_v42, %v2145_v42  ;;  %v931_v37 = vsub.f32 %v1942_v7, %v2049_v27  ;;  %v1139_v21 = vsel %vm805_vm2, %v1082_v40, 0.0 }
 0x191   : > { %v1138_v23 = vadd.f32 %v1137_v28, %v1136_v30  ;;  %v1038_v35 = vsel %vm805_vm2, %v930_v10, 0.0  ;;  %v1086_v40 = vmul.f32 %v2168_v25, %v2168_v25  ;;  %v935_v25 = vsub.f32 %v1958_v15, %v2049_v27 }
 0x192   : > { %v1033_v0 = vadd.f32 %v1032_v32, %v1031_v36  ;;  %v1084_v36 = vmul.f32 %v2152_v19, %v2152_v19  ;;  %v932_v32 = vsub.f32 %v1938_v5, %v2049_v27  ;;  %v1141_v33 = vsel %vm805_vm2, %v1083_v43, 0.0 }
 0x193   : > { %v1140_v42 = vadd.f32 %v1139_v21, %v1138_v23  ;;  %v1040_v30 = vsel %vm805_vm2, %v931_v37, 0.0  ;;  %v936_v43 = vsub.f32 %v1954_v13, %v2049_v27  ;;  %v1087_v21 = vmul.f32 %v2177_v34, %v2177_v34 }
 0x194   : > { %v1035_v41 = vadd.f32 %v1034_v2, %v1033_v0  ;;  %v933_v2 = vsub.f32 %v1950_v11, %v2049_v27  ;;  %v1143_v28 = vsel %vm805_vm2, %v1084_v36, 0.0  ;;  %v1042_v23 = vsel %vm805_vm2, %v932_v32, 0.0 }
 0x195   : > { %v1142_v19 = vadd.f32 %v1141_v33, %v1140_v42  ;;  %v1088_v33 = vmul.f32 %v2186_v38, %v2186_v38  ;;  %v974_v34 = vsel %vm762_vm4, %v936_v43, 0.0  ;;  %v1090_v38 = vmul.f32 %v2204_v26, %v2204_v26 }
 0x196   : > { %v1037_v18 = vadd.f32 %v1036_v39, %v1035_v41  ;;  %v934_v39 = vsub.f32 %v1946_v9, %v2049_v27  ;;  %v1044_v36 = vsel %vm805_vm2, %v933_v2, 0.0  ;;  %v1149_v27 = vsel %vm805_vm2, %v1087_v21, 0.0 }
 0x197   : > { %v1144_v22 = vadd.f32 %v1143_v28, %v1142_v19  ;;  %v1091_v43 = vmul.f32 %v2213_v29, %v2213_v29  ;;  %v1095_v29 = vmul.f32 %v932_v32, %v932_v32  ;;  %v1099_v32 = vmul.f32 %v974_v34, %v974_v34 }
 0x198   : > { %v1039_v0 = vadd.f32 %v1038_v35, %v1037_v18  ;;  %v1145_v35 = vsel %vm805_vm2, %v1085_v24, 0.0  ;;  %v1046_v19 = vsel %vm805_vm2, %v934_v39, 0.0  ;;  %v1089_v24 = vmul.f32 %v2195_v20, %v2195_v20 }
 0x199   : > { %v1146_v42 = vadd.f32 %v1145_v35, %v1144_v22  ;;  %v1050_v35 = vsel %vm805_vm2, %v974_v34, 0.0  ;;  %v1157_v26 = vsel %vm805_vm2, %v1091_v43, 0.0  ;;  %v1165_v43 = vsel %vm805_vm2, %v1095_v29, 0.0 }
 0x19a   : > { %v1041_v41 = vadd.f32 %v1040_v30, %v1039_v0  ;;  %v1147_v30 = vsel %vm805_vm2, %v1086_v40, 0.0  ;;  %v1151_v40 = vsel %vm805_vm2, %v1088_v33, 0.0  ;;  %v1153_v20 = vsel %vm805_vm2, %v1089_v24, 0.0 }
 0x19c   : > { %v1043_v18 = vadd.f32 %v1042_v23, %v1041_v41  ;;  %v1148_v41 = vadd.f32 %v1147_v30, %v1146_v42  ;;  %v1048_v23 = vsel %vm805_vm2, %v935_v25, 0.0  ;;  %v1155_v30 = vsel %vm805_vm2, %v1090_v38, 0.0 }
 0x19e   : > { %v1045_v0 = vadd.f32 %v1044_v36, %v1043_v18  ;;  %v1150_v22 = vadd.f32 %v1149_v27, %v1148_v41 }
 0x1a0   : > { %v1047_v28 = vadd.f32 %v1046_v19, %v1045_v0  ;;  %v1152_v36 = vadd.f32 %v1151_v40, %v1150_v22  ;;  %v1092_v0 = vmul.f32 %v929_v4, %v929_v4  ;;  %v1096_v4 = vmul.f32 %v933_v2, %v933_v2 }
 0x1a2   : > { %v1049_v18 = vadd.f32 %v1048_v23, %v1047_v28  ;;  %v1154_v42 = vadd.f32 %v1153_v20, %v1152_v36  ;;  %v1093_v28 = vmul.f32 %v930_v10, %v930_v10  ;;  %v1094_v23 = vmul.f32 %v931_v37, %v931_v37  ;;  %v975_v20 = vld [vmem:[#allocation3] sm:$0x1] }
 0x1a3   : > { %v1159_v22 = vsel %vm805_vm2, %v1092_v0, 0.0  ;;  %v1167_v0 = vsel %vm805_vm2, %v1096_v4, 0.0 }
 0x1a4   : > { %v1051_v31 = vadd.f32 %v1050_v35, %v1049_v18  ;;  %v1156_v19 = vadd.f32 %v1155_v30, %v1154_v42  ;;  %v1161_v24 = vsel %vm805_vm2, %v1093_v28, 0.0  ;;  %v1163_v38 = vsel %vm805_vm2, %v1094_v23, 0.0 }
 0x1a5   : > { %v1097_v42 = vmul.f32 %v934_v39, %v934_v39  ;;  %v1098_v30 = vmul.f32 %v935_v25, %v935_v25 }
 0x1a6   : > { %v1052_v21 = vrot.slane %v1051_v31, 4  ;;  %v1158_v33 = vadd.f32 %v1157_v26, %v1156_v19 }
 0x1a7   : > { %v1171_v28 = vsel %vm805_vm2, %v1098_v30, 0.0 }
 0x1a8   : > { %v1053_v41 = vadd.f32 %v1052_v21, %v1051_v31  ;;  %v1160_v18 = vadd.f32 %v1159_v22, %v1158_v33  ;;  %v1173_v33 = vsel %vm805_vm2, %v1099_v32, 0.0 }
 0x1aa   : > { %v1054_v27 = vrot.slane %v1053_v41, 2  ;;  %v1162_v35 = vadd.f32 %v1161_v24, %v1160_v18 }
 0x1ac   : > { %v1055_v40 = vadd.f32 %v1054_v27, %v1053_v41  ;;  %v1164_v31 = vadd.f32 %v1163_v38, %v1162_v35  ;;  %v1169_v41 = vsel %vm805_vm2, %v1097_v42, 0.0  ;;  %v1195_v42 = vld [vmem:[%s2582_s2] sm:$0x1] }
 0x1ae   : > { %v1056_v36 = vrot.slane %v1055_v40, 1  ;;  %v1166_v21 = vadd.f32 %v1165_v43, %v1164_v31 }
 0x1b0   : > { %v1057_v10 = vadd.f32 %v1056_v36, %v1055_v40  ;;  %v1168_v19 = vadd.f32 %v1167_v0, %v1166_v21  ;;  %v1061_v40 = vld [vmem:[#allocation4] sm:$0x1]  ;;  %v1188_v21 = vld [vmem:[#allocation2] sm:$0x1] }
 0x1b1   : > { %v1200_v0 = vld [vmem:[%s2583_s3] sm:$0x1] }
 0x1b2   : > { %v1058_v37 = vadd.f32 %v1057_v10, %v975_v20  ;;  %v1170_v2 = vadd.f32 %v1169_v41, %v1168_v19 }
 0x1b4   : > { %1060 = vst.msk [vmem:[#allocation3] sm:$0x1] %vm888_vm3, %v1058_v37  ;;  %v1172_v26 = vadd.f32 %v1171_v28, %v1170_v2 }
 0x1b6   : > { %v1174_v39 = vadd.f32 %v1173_v33, %v1172_v26 }
 0x1b8   : > { %v1175_v27 = vrot.slane %v1174_v39, 4 }
 0x1ba   : > { %v1176_v23 = vadd.f32 %v1175_v27, %v1174_v39 }
 0x1bb   : > { %v1186_v34 = vld [vmem:[#allocation3] sm:$0x1] }
 0x1bc   : > { %v1177_v22 = vrot.slane %v1176_v23, 2  ;;  %v1187_v35 = vmul.f32 0.0033333334, %v1186_v34 }
 0x1be   : > { %v1178_v18 = vadd.f32 %v1177_v22, %v1176_v23  ;;  %v1192_v36 = vmul.f32 %v1187_v35, %v1187_v35  ;;  %v1189_v37 = vadd.f32 %v1188_v21, %v1187_v35 }
 0x1c0   : > { %v1179_v25 = vrot.slane %v1178_v18, 1 }
 0x1c2   : > { %v1180_v29 = vadd.f32 %v1179_v25, %v1178_v18 }
 0x1c4   : > { %v1181_v24 = vadd.f32 %v1180_v29, %v1061_v40 }
 0x1c6   : > { %1182 = vst.msk [vmem:[#allocation4] sm:$0x1] %vm888_vm3, %v1181_v24 }
 0x1cd   : > { %v1190_v4 = vld [vmem:[#allocation4] sm:$0x1] }
 0x1ce   : > { %v1191_v38 = vmul.f32 0.0033333334, %v1190_v4 }
 0x1d0   : > { %v1193_v20 = vsub.f32 %v1191_v38, %v1192_v36 }
 0x1d2   : > { %v1194_v31 = vmax.f32 %v1193_v20, 0.0 }
 0x1d4   : > { %v1196_v10 = vadd.f32 1e-05, %v1194_v31 }
 0x1d6   : > { %1650 = vrsqrt.f32 %v1196_v10 }
 0x1e0   : > { %v1651_v43 = vpop.eup %1650 }
 0x1e1   : > { %v1198_v30 = vmul.f32 %v1651_v43, %v1195_v42 }
 0x1e3   : > { %1199 = vst.msk [vmem:[#allocation3] sm:$0x1] %vm888_vm3, %v1198_v30  ;;  %v1201_v19 = vmul.f32 %v1198_v30, %v1189_v37 }
 0x1e5   : > { %v1202_v32 = vsub.f32 %v1200_v0, %v1201_v19 }
 0x1e7   : > { %1203 = vst.msk [vmem:[#allocation4] sm:$0x1] %vm888_vm3, %v1202_v32 }
 0x1e8 PF: > { %p1495_p5 = scmp.ne.s32.totalorder %s1666_s15, 1 }
 0x1e9   : > { %vm1336_vm5 = vcmask (!%p1495_p5), 261120   ;;  %v2593_v31 = vld [vmem:[#allocation6_spill] sm:$0xff] (!%p1495_p5)  ;;  %v2594_v42 = vld [vmem:[#allocation5_spill] sm:$0xff] (!%p1495_p5)  ;;  %v2596_v37 = vld [vmem:[#allocation8_spill] sm:$0xff] (!%p1495_p5) }
 0x1ea   : > { %1207 = sbr.rel (%p1495_p5) target bundleno = 526 (0x20e), region = 52  ;;  %v2301_v41 = vld [vmem:[#allocation3] ss:$0 sm:$0xff] (!%p1495_p5) }
 0x1eb   : > { %v1215_v28 = vmul.f32 (!%p1495_p5), %v2301_v41, %v1892_v46  ;;  %v1216_v26 = vmul.f32 (!%p1495_p5), %v1888_v44, %v2301_v41  ;;  %v1217_v33 = vmul.f32 (!%p1495_p5), %v2301_v41, %v1900_v50  ;;  %v1218_v39 = vmul.f32 (!%p1495_p5), %v1896_v48, %v2301_v41 }
 0x1ec   : > { %v1219_v27 = vmul.f32 (!%p1495_p5), %v2301_v41, %v1908_v54  ;;  %v1220_v23 = vmul.f32 (!%p1495_p5), %v1904_v52, %v2301_v41  ;;  %v1221_v22 = vmul.f32 (!%p1495_p5), %v2301_v41, %v1916_v58  ;;  %v1222_v46 = vmul.f32 (!%p1495_p5), %v1912_v56, %v2301_v41 }
 0x1ed   : > { %v1223_v38 = vmul.f32 (!%p1495_p5), %v2301_v41, %v1924_v62  ;;  %v1224_v20 = vmul.f32 (!%p1495_p5), %v1920_v60, %v2301_v41  ;;  %v1225_v10 = vmul.f32 (!%p1495_p5), %v2301_v41, %v2593_v31  ;;  %v1226_v43 = vmul.f32 (!%p1495_p5), %v2594_v42, %v2301_v41  ;;  %v2595_v62 = vld [vmem:[#allocation7_spill] sm:$0xff] (!%p1495_p5) }
 0x1ee   : > { %v2303_v2 = vld [vmem:[#allocation4] ss:$0 sm:$0xff] (!%p1495_p5)  ;;  %v1227_v60 = vmul.f32 (!%p1495_p5), %v2301_v41, %v1940_v6  ;;  %v1228_v21 = vmul.f32 (!%p1495_p5), %v2595_v62, %v2301_v41  ;;  %v1229_v30 = vmul.f32 (!%p1495_p5), %v2301_v41, %v2596_v37  ;;  %v1230_v0 = vmul.f32 (!%p1495_p5), %v1944_v8, %v2301_v41 }
 0x1ef   : > { %v1260_v44 = vadd.f32 (!%p1495_p5), %v2303_v2, %v1215_v28  ;;  %v1261_v18 = vadd.f32 (!%p1495_p5), %v2303_v2, %v1216_v26  ;;  %v1262_v50 = vadd.f32 (!%p1495_p5), %v2303_v2, %v1217_v33  ;;  %v1263_v48 = vadd.f32 (!%p1495_p5), %v2303_v2, %v1218_v39 }
 0x1f0   : > { %v1264_v25 = vadd.f32 (!%p1495_p5), %v2303_v2, %v1219_v27  ;;  %v1265_v54 = vadd.f32 (!%p1495_p5), %v2303_v2, %v1220_v23  ;;  %v1266_v52 = vadd.f32 (!%p1495_p5), %v2303_v2, %v1221_v22  ;;  %v1267_v40 = vadd.f32 (!%p1495_p5), %v2303_v2, %v1222_v46 }
 0x1f1   : > { %v1298_v58 = vmax.f32 %v1260_v44, 0.0  ;;  %v1299_v29 = vmax.f32 %v1261_v18, 0.0  ;;  %v1300_v24 = vmax.f32 %v1262_v50, 0.0  ;;  %v1301_v56 = vmax.f32 %v1263_v48, 0.0 }
 0x1f2   : > { %v1302_v34 = vmax.f32 %v1264_v25, 0.0  ;;  %v1303_v35 = vmax.f32 %v1265_v54, 0.0  ;;  %v1304_v36 = vmax.f32 %v1266_v52, 0.0  ;;  %v1305_v4 = vmax.f32 %v1267_v40, 0.0 }
 0x1f3   : > { %1337 = vst.msk [vmem:[%s2584_s4] sm:$0xff] %vm1336_vm5, %v1298_v58  ;;  %1338 = vst.msk [vmem:[%s2584_s4 + $0x8] sm:$0xff] %vm1336_vm5, %v1299_v29  ;;  %v1268_v19 = vadd.f32 %v2303_v2, %v1223_v38  ;;  %v1269_v32 = vadd.f32 %v2303_v2, %v1224_v20  ;;  %v1270_v28 = vadd.f32 %v2303_v2, %v1225_v10 }
 0x1f4   : > { %1339 = vst.msk [vmem:[%s2584_s4 + $0x10] sm:$0xff] %vm1336_vm5, %v1300_v24  ;;  %1340 = vst.msk [vmem:[%s2584_s4 + $0x18] sm:$0xff] %vm1336_vm5, %v1301_v56  ;;  %v1271_v26 = vadd.f32 %v2303_v2, %v1226_v43  ;;  %v1272_v33 = vadd.f32 %v2303_v2, %v1227_v60  ;;  %v1273_v6 = vadd.f32 %v2303_v2, %v1228_v21 }
 0x1f5   : > { %1341 = vst.msk [vmem:[%s2584_s4 + $0x20] sm:$0xff] %vm1336_vm5, %v1302_v34  ;;  %1342 = vst.msk [vmem:[%s2584_s4 + $0x28] sm:$0xff] %vm1336_vm5, %v1303_v35  ;;  %v1274_v39 = vadd.f32 %v2303_v2, %v1229_v30  ;;  %v1275_v27 = vadd.f32 %v2303_v2, %v1230_v0  ;;  %v1306_v23 = vmax.f32 %v1268_v19, 0.0  ;;  %v1307_v22 = vmax.f32 %v1269_v32, 0.0 }
 0x1f6   : > { %1343 = vst.msk [vmem:[%s2584_s4 + $0x30] sm:$0xff] %vm1336_vm5, %v1304_v36  ;;  %1344 = vst.msk [vmem:[%s2584_s4 + $0x38] sm:$0xff] %vm1336_vm5, %v1305_v4  ;;  %v1308_v46 = vmax.f32 %v1270_v28, 0.0  ;;  %v1309_v8 = vmax.f32 %v1271_v26, 0.0  ;;  %v1310_v44 = vmax.f32 %v1272_v33, 0.0  ;;  %v1311_v18 = vmax.f32 %v1273_v6, 0.0 }
 0x1f7   : > { %v1312_v50 = vmax.f32 %v1274_v39, 0.0  ;;  %v1313_v48 = vmax.f32 %v1275_v27, 0.0  ;;  %1345 = vst.msk [vmem:[%s2584_s4 + $0x40] sm:$0xff] %vm1336_vm5, %v1306_v23  ;;  %1346 = vst.msk [vmem:[%s2584_s4 + $0x48] sm:$0xff] %vm1336_vm5, %v1307_v22  ;;  %v1231_v25 = vmul.f32 %v2301_v41, %v1956_v14  ;;  %v1232_v54 = vmul.f32 %v1952_v12, %v2301_v41 }
 0x1f8   : > { %1347 = vst.msk [vmem:[%s2584_s4 + $0x50] sm:$0xff] %vm1336_vm5, %v1308_v46  ;;  %1348 = vst.msk [vmem:[%s2584_s4 + $0x58] sm:$0xff] %vm1336_vm5, %v1309_v8  ;;  %v1233_v52 = vmul.f32 %v2301_v41, %v1962_v17  ;;  %v1234_v40 = vmul.f32 %v1960_v16, %v2301_v41  ;;  %v1235_v12 = vmul.f32 %v2301_v41, %v1894_v47 }
 0x1f9   : > { %1349 = vst.msk [vmem:[%s2584_s4 + $0x60] sm:$0xff] %vm1336_vm5, %v1310_v44  ;;  %1350 = vst.msk [vmem:[%s2584_s4 + $0x68] sm:$0xff] %vm1336_vm5, %v1311_v18  ;;  %v1236_v14 = vmul.f32 %v1890_v45, %v2301_v41  ;;  %v1237_v16 = vmul.f32 %v2301_v41, %v1902_v51  ;;  %v1238_v17 = vmul.f32 %v1898_v49, %v2301_v41 }
 0x1fa   : > { %1351 = vst.msk [vmem:[%s2584_s4 + $0x70] sm:$0xff] %vm1336_vm5, %v1312_v50  ;;  %1352 = vst.msk [vmem:[%s2584_s4 + $0x78] sm:$0xff] %vm1336_vm5, %v1313_v48  ;;  %v1276_v58 = vadd.f32 %v2303_v2, %v1231_v25  ;;  %v1277_v29 = vadd.f32 %v2303_v2, %v1232_v54  ;;  %v1278_v24 = vadd.f32 %v2303_v2, %v1233_v52 }
 0x1fb   : > { %v1279_v56 = vadd.f32 %v2303_v2, %v1234_v40  ;;  %v1280_v34 = vadd.f32 %v2303_v2, %v1235_v12  ;;  %v1281_v47 = vadd.f32 %v2303_v2, %v1236_v14  ;;  %v1282_v45 = vadd.f32 %v2303_v2, %v1237_v16 }
 0x1fc   : > { %v1283_v35 = vadd.f32 %v2303_v2, %v1238_v17  ;;  %v1314_v51 = vmax.f32 %v1276_v58, 0.0  ;;  %v1315_v36 = vmax.f32 %v1277_v29, 0.0  ;;  %v1316_v4 = vmax.f32 %v1278_v24, 0.0 }
 0x1fd   : > { %v1317_v49 = vmax.f32 %v1279_v56, 0.0  ;;  %v1318_v38 = vmax.f32 %v1280_v34, 0.0  ;;  %v1319_v20 = vmax.f32 %v1281_v47, 0.0  ;;  %v1320_v31 = vmax.f32 %v1282_v45, 0.0 }
 0x1fe   : > { %v1321_v10 = vmax.f32 %v1283_v35, 0.0  ;;  %1353 = vst.msk [vmem:[%s2584_s4 + $0x80] sm:$0xff] %vm1336_vm5, %v1314_v51  ;;  %1354 = vst.msk [vmem:[%s2584_s4 + $0x88] sm:$0xff] %vm1336_vm5, %v1315_v36  ;;  %v1239_v42 = vmul.f32 %v2301_v41, %v1910_v55  ;;  %v1240_v43 = vmul.f32 %v1906_v53, %v2301_v41  ;;  %v1241_v60 = vmul.f32 %v2301_v41, %v1918_v59 }
 0x1ff   : > { %1355 = vst.msk [vmem:[%s2584_s4 + $0x90] sm:$0xff] %vm1336_vm5, %v1316_v4  ;;  %1356 = vst.msk [vmem:[%s2584_s4 + $0x98] sm:$0xff] %vm1336_vm5, %v1317_v49  ;;  %v1242_v62 = vmul.f32 %v1914_v57, %v2301_v41  ;;  %v1243_v53 = vmul.f32 %v2301_v41, %v1926_v63  ;;  %v1244_v55 = vmul.f32 %v1922_v61, %v2301_v41 }
 0x200   : > { %1357 = vst.msk [vmem:[%s2584_s4 + $0xa0] sm:$0xff] %vm1336_vm5, %v1318_v38  ;;  %1358 = vst.msk [vmem:[%s2584_s4 + $0xa8] sm:$0xff] %vm1336_vm5, %v1319_v20  ;;  %v1245_v57 = vmul.f32 %v2301_v41, %v1934_v3  ;;  %v1246_v59 = vmul.f32 %v1930_v1, %v2301_v41  ;;  %v1284_v21 = vadd.f32 %v2303_v2, %v1239_v42 }
 0x201   : > { %1359 = vst.msk [vmem:[%s2584_s4 + $0xb0] sm:$0xff] %vm1336_vm5, %v1320_v31  ;;  %1360 = vst.msk [vmem:[%s2584_s4 + $0xb8] sm:$0xff] %vm1336_vm5, %v1321_v10  ;;  %v1285_v37 = vadd.f32 %v2303_v2, %v1240_v43  ;;  %v1286_v30 = vadd.f32 %v2303_v2, %v1241_v60  ;;  %v1287_v0 = vadd.f32 %v2303_v2, %v1242_v62 }
 0x202   : > { %v1288_v19 = vadd.f32 %v2303_v2, %v1243_v53  ;;  %v1289_v63 = vadd.f32 %v2303_v2, %v1244_v55  ;;  %v1290_v61 = vadd.f32 %v2303_v2, %v1245_v57  ;;  %v1291_v32 = vadd.f32 %v2303_v2, %v1246_v59 }
 0x203   : > { %v1322_v3 = vmax.f32 %v1284_v21, 0.0  ;;  %v1323_v28 = vmax.f32 %v1285_v37, 0.0  ;;  %v1324_v26 = vmax.f32 %v1286_v30, 0.0  ;;  %v1325_v1 = vmax.f32 %v1287_v0, 0.0 }
 0x204   : > { %v1326_v33 = vmax.f32 %v1288_v19, 0.0  ;;  %v1327_v6 = vmax.f32 %v1289_v63, 0.0  ;;  %v1328_v39 = vmax.f32 %v1290_v61, 0.0  ;;  %v1329_v27 = vmax.f32 %v1291_v32, 0.0 }
 0x205   : > { %1361 = vst.msk [vmem:[%s2584_s4 + $0xc0] sm:$0xff] %vm1336_vm5, %v1322_v3  ;;  %1362 = vst.msk [vmem:[%s2584_s4 + $0xc8] sm:$0xff] %vm1336_vm5, %v1323_v28  ;;  %v1247_v23 = vmul.f32 %v2301_v41, %v1942_v7  ;;  %v1248_v22 = vmul.f32 %v1938_v5, %v2301_v41  ;;  %v1249_v46 = vmul.f32 %v2301_v41, %v1950_v11 }
 0x206   : > { %1363 = vst.msk [vmem:[%s2584_s4 + $0xd0] sm:$0xff] %vm1336_vm5, %v1324_v26  ;;  %1364 = vst.msk [vmem:[%s2584_s4 + $0xd8] sm:$0xff] %vm1336_vm5, %v1325_v1  ;;  %v1250_v8 = vmul.f32 %v1946_v9, %v2301_v41  ;;  %v1251_v5 = vmul.f32 %v2301_v41, %v1958_v15  ;;  %v1252_v7 = vmul.f32 %v1954_v13, %v2301_v41 }
 0x207   : > { %1365 = vst.msk [vmem:[%s2584_s4 + $0xe0] sm:$0xff] %vm1336_vm5, %v1326_v33  ;;  %1366 = vst.msk [vmem:[%s2584_s4 + $0xe8] sm:$0xff] %vm1336_vm5, %v1327_v6  ;;  %v1292_v9 = vadd.f32 %v2303_v2, %v1247_v23  ;;  %v1293_v11 = vadd.f32 %v2303_v2, %v1248_v22  ;;  %v1294_v44 = vadd.f32 %v2303_v2, %v1249_v46 }
 0x208   : > { %1367 = vst.msk [vmem:[%s2584_s4 + $0xf0] sm:$0xff] %vm1336_vm5, %v1328_v39  ;;  %1368 = vst.msk [vmem:[%s2584_s4 + $0xf8] sm:$0xff] %vm1336_vm5, %v1329_v27  ;;  %v1295_v18 = vadd.f32 %v2303_v2, %v1250_v8  ;;  %v1296_v50 = vadd.f32 %v2303_v2, %v1251_v5  ;;  %v1297_v48 = vadd.f32 %v2303_v2, %v1252_v7 }
 0x209   : > { %v1330_v25 = vmax.f32 %v1292_v9, 0.0  ;;  %v1331_v54 = vmax.f32 %v1293_v11, 0.0  ;;  %v1332_v52 = vmax.f32 %v1294_v44, 0.0 }
 0x20a   : > { %v1333_v40 = vmax.f32 %v1295_v18, 0.0  ;;  %v1334_v15 = vmax.f32 %v1296_v50, 0.0  ;;  %v1335_v12 = vmax.f32 %v1297_v48, 0.0 }
 0x20b   : > { %1369 = vst.msk [vmem:[%s2584_s4 + $0x100] sm:$0xff] %vm1336_vm5, %v1330_v25  ;;  %1370 = vst.msk [vmem:[%s2584_s4 + $0x108] sm:$0xff] %vm1336_vm5, %v1331_v54 }
 0x20c   : > { %1371 = vst.msk [vmem:[%s2584_s4 + $0x110] sm:$0xff] %vm1336_vm5, %v1332_v52  ;;  %1372 = vst.msk [vmem:[%s2584_s4 + $0x118] sm:$0xff] %vm1336_vm5, %v1333_v40 }
 0x20d   : > { %1373 = vst.msk [vmem:[%s2584_s4 + $0x120] sm:$0xff] %vm1336_vm5, %v1334_v15  ;;  %1374 = vst.msk [vmem:[%s2584_s4 + $0x128] sm:$0xff] %vm1336_vm5, %v1335_v12 }
 0x20e PF: > { %s14_s17 = sadd.s32 1, %s1674_s17   ;;  %s2597_s15 = smov %s1670_s16 }
 0x20f   : > { %p11_p6 = scmp.ge.s32.totalorder %s14_s17, 4   ;;  %s2598_s16 = smov %s2600_s18 }
 0x211   :  { %13 = sbr.rel (!%p11_p6) target bundleno = 2 (0x2), region = 82 }

</bundles_post_ra>
